<compile_context>
chip_gen: v7x
topology: tpu7x:2x2x1
jax: 0.10.0
libtpu: 0.0.40
codegen_flags: <defaults>
</compile_context>

<pallas_src>
import functools
import math

import jax
import jax.numpy as jnp
from jax.experimental import pallas as pl
from jax.experimental.pallas import tpu as pltpu


def _round_up(x, m):
    return (x + m - 1) // m * m


def _attn_gru_kernel(fact_ref, c_ref, g_ref, wf_ref, uf_ref,
                     br_ref, bw_ref, bu_ref, o_ref, *, n_j):
    """Grid = (H tiles, batch tiles); batch is innermost.

    fact_ref : (tb, Ip)      f32 activations
    c_ref    : (tb, Hp)      f32 hidden state (full width: contraction + blend)
    g_ref    : (tb, 1)       f32 gate
    wf_ref   : (Ip, 2*th)    [Wr^T | W^T] column tile (bf16 by default)
    uf_ref   : (Hp, 2*th)    [Ur^T | U^T] column tile
    br/bw/bu : (1, th)       f32 biases (br already fused with bur)
    o_ref    : (tb, th)      f32 output tile
    """
    th = o_ref.shape[-1]
    cdt = wf_ref.dtype

    fact = fact_ref[...].astype(cdt)          # (tb, Ip)
    c_lo = c_ref[...].astype(cdt)             # (tb, Hp)

    # Two fused MXU dots (N = 2*th), f32 accumulation.
    fw = jnp.dot(fact, wf_ref[...], preferred_element_type=jnp.float32)  # (tb, 2*th)
    fu = jnp.dot(c_lo, uf_ref[...], preferred_element_type=jnp.float32)  # (tb, 2*th)

    # r = sigmoid(Wr f + Ur C + (br + bur))
    r = jax.nn.sigmoid(fw[:, :th] + fu[:, :th] + br_ref[...])
    # h_tilda = tanh(W f + bw + r * (U C + bu))
    h_tilda = jnp.tanh(fw[:, th:] + bw_ref[...] + r * (fu[:, th:] + bu_ref[...]))

    # Blend tile of C (f32), sliced from the full row block (no duplicate input).
    if n_j == 1:
        c_tile = c_ref[...]
    else:
        start = pl.multiple_of(pl.program_id(0) * th, th)
        c_tile = c_ref[:, pl.ds(start, th)]

    g = g_ref[...]                            # (tb, 1), broadcasts over lanes
    o_ref[...] = (c_tile + g * (h_tilda - c_tile)).astype(o_ref.dtype)


def prepare_params(wr, br, ur, bur, w, bw, u, bu, *, th=None,
                   weight_dtype=jnp.bfloat16):
    """One-time parameter prep (hoisted out of the per-call path).

    Transposes weights to (in, out), pads to lane multiples, fuses the two
    r-branch biases, fuses Wr/W and Ur/U along the output dim with a per-th-tile
    interleave so each (.., 2*th) weight block = [r-branch tile | h-branch tile],
    and casts weights to `weight_dtype` (bf16 by default) for streaming.
    """
    H, I = wr.shape
    Ip, Hp = _round_up(I, 128), _round_up(H, 128)
    wbytes = jnp.zeros((), weight_dtype).dtype.itemsize

    if th is None:
        # Resident-weight mode if double-buffered fused weights fit comfortably
        # (conservative so it also holds on v7x's 64 MiB VMEM).
        resident_vmem = 2 * (Ip + Hp) * 2 * Hp * wbytes
        if resident_vmem <= 24 * 1024 * 1024:
            th = Hp
        elif Hp % 256 == 0:
            th = 256
        else:
            th = 128
    assert th % 128 == 0 and Hp % th == 0
    n_j = Hp // th

    def pad_t(m, rows):
        mt = m.T.astype(jnp.float32)                      # (in, out)
        return jnp.pad(mt, ((0, rows - mt.shape[0]), (0, Hp - mt.shape[1])))

    def interleave(a_t, b_t, rows):
        # (rows, Hp) x 2 -> (rows, 2*Hp) with per-th-tile layout [a_j | b_j].
        a3 = a_t.reshape(rows, n_j, th)
        b3 = b_t.reshape(rows, n_j, th)
        return jnp.concatenate([a3, b3], axis=2).reshape(rows, 2 * Hp).astype(weight_dtype)

    def pad_b(b):
        return jnp.pad(b.astype(jnp.float32), (0, Hp - b.shape[0])).reshape(1, Hp)

    wr_t, w_t = pad_t(wr, Ip), pad_t(w, Ip)
    ur_t, u_t = pad_t(ur, Hp), pad_t(u, Hp)

    return dict(
        input_size=I, hidden_size=H, padded_input=Ip, padded_hidden=Hp, th=th,
        w_fused=interleave(wr_t, w_t, Ip),    # (Ip, 2*Hp)
        u_fused=interleave(ur_t, u_t, Hp),    # (Hp, 2*Hp)
        b_r=pad_b(br + bur), b_w=pad_b(bw), b_u=pad_b(bu),
    )


def attention_gru_cell_forward_padded(fact_p, c_p, g_p, params, *, tb=256):
    """Hot-path entry: inputs already padded to (Bp, Ip)/(Bp, Hp)/(Bp, 1)."""
    Bp, Ip = fact_p.shape
    Hp = params["padded_hidden"]
    th = params["th"]
    n_j = Hp // th
    assert Bp % 8 == 0 and c_p.shape == (Bp, Hp) and g_p.shape == (Bp, 1)

    # Batch tile: sweepable; clamp to a multiple of 8 that divides Bp.
    tb = max(8, (min(tb, Bp) // 8) * 8)
    while Bp % tb:
        tb -= 8
    n_i = Bp // tb

    grid = (n_j, n_i)  # batch innermost -> each weight column tile streams once

    wbytes = params["w_fused"].dtype.itemsize
    flops = 4 * Bp * Hp * (Ip + Hp)
    bytes_accessed = ((Ip + Hp) * 2 * Hp * wbytes            # weights, fetched once
                      + 3 * Hp * 4                            # biases
                      + n_j * Bp * (Ip + Hp + 1) * 4          # activations, n_j passes
                      + Bp * Hp * 4)                          # output
    cost = pl.CostEstimate(flops=flops, transcendentals=2 * Bp * Hp,
                           bytes_accessed=bytes_accessed)

    # VMEM footprint (double-buffered), capped at 48 MiB for v7x headroom.
    act_bytes = tb * (Ip + Hp + 1 + th) * 4
    wgt_bytes = (Ip + Hp) * 2 * th * wbytes + 3 * th * 4
    vmem_est = 2 * (act_bytes + wgt_bytes)
    vmem_limit = int(min(48 * 1024 * 1024, max(32 * 1024 * 1024, 2 * vmem_est)))

    kernel = functools.partial(_attn_gru_kernel, n_j=n_j)

    out = pl.pallas_call(
        kernel,
        out_shape=jax.ShapeDtypeStruct((Bp, Hp), jnp.float32),
        grid_spec=pltpu.PrefetchScalarGridSpec(
            num_scalar_prefetch=0,
            grid=grid,
            in_specs=[
                pl.BlockSpec((tb, Ip), lambda j, i: (i, 0)),        # fact rows
                pl.BlockSpec((tb, Hp), lambda j, i: (i, 0)),        # C rows (contraction + blend)
                pl.BlockSpec((tb, 1), lambda j, i: (i, 0)),         # g
                pl.BlockSpec((Ip, 2 * th), lambda j, i: (0, j)),    # [Wr|W]^T col tile
                pl.BlockSpec((Hp, 2 * th), lambda j, i: (0, j)),    # [Ur|U]^T col tile
                pl.BlockSpec((1, th), lambda j, i: (0, j)),         # b_r (= br + bur)
                pl.BlockSpec((1, th), lambda j, i: (0, j)),         # b_w
                pl.BlockSpec((1, th), lambda j, i: (0, j)),         # b_u
            ],
            out_specs=pl.BlockSpec((tb, th), lambda j, i: (i, j)),
        ),
        compiler_params=pltpu.CompilerParams(
            dimension_semantics=("parallel", "parallel"),
            vmem_limit_bytes=vmem_limit),
        cost_estimate=cost,
    )(fact_p, c_p, g_p, params["w_fused"], params["u_fused"],
      params["b_r"], params["b_w"], params["b_u"])
    return out


def attention_gru_cell_forward(fact, C, g, params, *, tb=256):
    """Convenience wrapper for unaligned shapes: pads, calls the hot path, slices.

    For a GRU cell driven inside a per-time-step scan, pad once outside the scan
    and call attention_gru_cell_forward_padded directly instead.
    """
    B, I = fact.shape
    H = params["hidden_size"]
    Ip, Hp = params["padded_input"], params["padded_hidden"]

    tb_eff = max(8, min(tb, _round_up(B, 8)))
    Bp = _round_up(B, tb_eff)

    fact_p = jnp.pad(fact.astype(jnp.float32), ((0, Bp - B), (0, Ip - I)))
    c_p = jnp.pad(C.astype(jnp.float32), ((0, Bp - B), (0, Hp - H)))
    g_p = jnp.pad(g.astype(jnp.float32), (0, Bp - B)).reshape(Bp, 1)

    out = attention_gru_cell_forward_padded(fact_p, c_p, g_p, params, tb=tb_eff)
    return out[:B, :H]


def init_params(key, input_size, hidden_size):
    """Matches nn.Linear init with xavier_normal_ weights (default PyTorch biases)."""
    ks = jax.random.split(key, 8)

    def xavier(k, out_f, in_f):
        std = math.sqrt(2.0 / (in_f + out_f))
        return std * jax.random.normal(k, (out_f, in_f), jnp.float32)

    def lin_bias(k, out_f, in_f):
        bound = 1.0 / math.sqrt(in_f)
        return jax.random.uniform(k, (out_f,), jnp.float32, -bound, bound)

    wr = xavier(ks[0], hidden_size, input_size)
    br = lin_bias(ks[1], hidden_size, input_size)
    ur = xavier(ks[2], hidden_size, hidden_size)
    bur = lin_bias(ks[3], hidden_size, hidden_size)
    w = xavier(ks[4], hidden_size, input_size)
    bw = lin_bias(ks[5], hidden_size, input_size)
    u = xavier(ks[6], hidden_size, hidden_size)
    bu = lin_bias(ks[7], hidden_size, hidden_size)
    return wr, br, ur, bur, w, bw, u, bu


def _reference(fact, C, g, raw, cast_dtype=None):
    """Plain-JAX reference; optionally with bf16-matched matmul inputs."""
    wr, br, ur, bur, w, bw, u, bu = raw
    if cast_dtype is None:
        dot = lambda a, b: jnp.dot(a, b, preferred_element_type=jnp.float32)
    else:
        dot = lambda a, b: jnp.dot(a.astype(cast_dtype), b.astype(cast_dtype),
                                   preferred_element_type=jnp.float32)
    r = jax.nn.sigmoid(dot(fact, wr.T) + br + dot(C, ur.T) + bur)
    h_tilda = jnp.tanh(dot(fact, w.T) + bw + r * (dot(C, u.T) + bu))
    return g[:, None] * h_tilda + (1.0 - g[:, None]) * C


if __name__ == "__main__":
    key = jax.random.PRNGKey(0)
    keys = jax.random.split(key, 8)

    # ---- Test 1: small shapes matching the module (B=2, hidden=32) ----------
    batch, hidden = 2, 32
    input_size = hidden  # fact is the embedding => input_size == hidden_size
    fact = jax.random.normal(keys[0], (batch, input_size), jnp.float32)
    C = jax.random.normal(keys[1], (batch, hidden), jnp.float32)
    g = jax.random.uniform(keys[2], (batch,), jnp.float32)

    raw = init_params(keys[3], input_size, hidden)
    params = prepare_params(*raw)                 # resident weights, 1x1 grid

    h = attention_gru_cell_forward(fact, C, g, params)
    jax.block_until_ready(h)
    assert h.shape == (batch, hidden)
    ref_bf = _reference(fact, C, g, raw, cast_dtype=jnp.bfloat16)
    ref_f32 = _reference(fact, C, g, raw)
    assert jnp.allclose(h, ref_bf, atol=2e-3, rtol=2e-3)
    assert jnp.allclose(h, ref_f32, atol=8e-2, rtol=8e-2)

    # ---- Test 2: multi-tile config (weight streaming, interleaved fusion,
    #              batch tiling, dynamic blend-tile slice) --------------------
    batch2, input2, hidden2 = 24, 96, 256
    fact2 = jax.random.normal(keys[4], (batch2, input2), jnp.float32)
    C2 = jax.random.normal(keys[5], (batch2, hidden2), jnp.float32)
    g2 = jax.random.uniform(keys[6], (batch2,), jnp.float32)

    raw2 = init_params(keys[7], input2, hidden2)
    params2 = prepare_params(*raw2, th=128)       # force 2 H tiles (streaming)

    h2 = attention_gru_cell_forward(fact2, C2, g2, params2, tb=8)  # 3 batch tiles
    jax.block_until_ready(h2)
    assert h2.shape == (batch2, hidden2)
    ref2_bf = _reference(fact2, C2, g2, raw2, cast_dtype=jnp.bfloat16)
    ref2_f32 = _reference(fact2, C2, g2, raw2)
    assert jnp.allclose(h2, ref2_bf, atol=2e-3, rtol=2e-3)
    assert jnp.allclose(h2, ref2_f32, atol=8e-2, rtol=8e-2)

    print("KERNEL_OK")
</pallas_src>

<mosaic_0001>
module attributes {stable_mosaic.version = 11 : i64} {
  func.func @_attn_gru_kernel(%arg0: i32, %arg1: i32, %arg2: memref<8x128xf32, #tpu.memory_space<vmem>>, %arg3: memref<8x128xf32, #tpu.memory_space<vmem>>, %arg4: memref<8x1xf32, #tpu.memory_space<vmem>>, %arg5: memref<128x256xbf16, #tpu.memory_space<vmem>>, %arg6: memref<128x256xbf16, #tpu.memory_space<vmem>>, %arg7: memref<1x128xf32, #tpu.memory_space<vmem>>, %arg8: memref<1x128xf32, #tpu.memory_space<vmem>>, %arg9: memref<1x128xf32, #tpu.memory_space<vmem>>, %arg10: memref<8x128xf32, #tpu.memory_space<vmem>>) attributes {dimension_semantics = [#tpu.dimension_semantics<parallel>, #tpu.dimension_semantics<parallel>], iteration_bounds = array<i64: 1, 1>, scalar_prefetch = 0 : i64, scratch_operands = 0 : i64, tpu.core_type = #tpu.core_type<tc>, window_params = [{transform_indices = @transform_0, window_bounds = array<i64: 8, 128>}, {transform_indices = @transform_1, window_bounds = array<i64: 8, 128>}, {transform_indices = @transform_2, window_bounds = array<i64: 8, 1>}, {transform_indices = @transform_3, window_bounds = array<i64: 128, 256>}, {transform_indices = @transform_4, window_bounds = array<i64: 128, 256>}, {transform_indices = @transform_5, window_bounds = array<i64: 1, 128>}, {transform_indices = @transform_6, window_bounds = array<i64: 1, 128>}, {transform_indices = @transform_7, window_bounds = array<i64: 1, 128>}, {transform_indices = @transform_8, window_bounds = array<i64: 8, 128>}]} {
    %c0 = arith.constant 0 : index
    %c0_0 = arith.constant 0 : index
    %0 = vector.load %arg2[%c0, %c0_0] : memref<8x128xf32, #tpu.memory_space<vmem>>, vector<8x128xf32>
    %1 = arith.truncf %0 : vector<8x128xf32> to vector<8x128xbf16>
    %c0_1 = arith.constant 0 : index
    %c0_2 = arith.constant 0 : index
    %2 = vector.load %arg3[%c0_1, %c0_2] : memref<8x128xf32, #tpu.memory_space<vmem>>, vector<8x128xf32>
    %3 = arith.truncf %2 : vector<8x128xf32> to vector<8x128xbf16>
    %c0_3 = arith.constant 0 : index
    %c0_4 = arith.constant 0 : index
    %4 = vector.load %arg5[%c0_3, %c0_4] : memref<128x256xbf16, #tpu.memory_space<vmem>>, vector<128x256xbf16>
    %cst = arith.constant dense<0.000000e+00> : vector<8x256xf32>
    %5 = tpu.matmul %1, %4, %cst {dimension_numbers = #tpu.dot_dimension_numbers<[1], [0], [0], [1], [0, 0, 1, 1], [], []>} : vector<8x128xbf16>, vector<128x256xbf16>, vector<8x256xf32> -> vector<8x256xf32>
    %c0_5 = arith.constant 0 : index
    %c0_6 = arith.constant 0 : index
    %6 = vector.load %arg6[%c0_5, %c0_6] : memref<128x256xbf16, #tpu.memory_space<vmem>>, vector<128x256xbf16>
    %cst_7 = arith.constant dense<0.000000e+00> : vector<8x256xf32>
    %7 = tpu.matmul %3, %6, %cst_7 {dimension_numbers = #tpu.dot_dimension_numbers<[1], [0], [0], [1], [0, 0, 1, 1], [], []>} : vector<8x128xbf16>, vector<128x256xbf16>, vector<8x256xf32> -> vector<8x256xf32>
    %8 = vector.extract_strided_slice %5 {offsets = [0, 0], sizes = [8, 128], strides = [1, 1]} : vector<8x256xf32> to vector<8x128xf32>
    %9 = vector.extract_strided_slice %7 {offsets = [0, 0], sizes = [8, 128], strides = [1, 1]} : vector<8x256xf32> to vector<8x128xf32>
    %10 = arith.addf %8, %9 : vector<8x128xf32>
    %c0_8 = arith.constant 0 : index
    %c0_9 = arith.constant 0 : index
    %11 = vector.load %arg7[%c0_8, %c0_9] : memref<1x128xf32, #tpu.memory_space<vmem>>, vector<1x128xf32>
    %12 = vector.broadcast %11 : vector<1x128xf32> to vector<8x128xf32>
    %13 = arith.addf %10, %12 : vector<8x128xf32>
    %14 = arith.negf %13 : vector<8x128xf32>
    %15 = math.exp %14 : vector<8x128xf32>
    %cst_10 = arith.constant 1.000000e+00 : f32
    %16 = vector.broadcast %cst_10 : f32 to vector<8x128xf32>
    %17 = arith.addf %16, %15 : vector<8x128xf32>
    %18 = arith.divf %16, %17 : vector<8x128xf32>
    %19 = vector.extract_strided_slice %5 {offsets = [0, 128], sizes = [8, 128], strides = [1, 1]} : vector<8x256xf32> to vector<8x128xf32>
    %c0_11 = arith.constant 0 : index
    %c0_12 = arith.constant 0 : index
    %20 = vector.load %arg8[%c0_11, %c0_12] : memref<1x128xf32, #tpu.memory_space<vmem>>, vector<1x128xf32>
    %21 = vector.broadcast %20 : vector<1x128xf32> to vector<8x128xf32>
    %22 = arith.addf %19, %21 : vector<8x128xf32>
    %23 = vector.extract_strided_slice %7 {offsets = [0, 128], sizes = [8, 128], strides = [1, 1]} : vector<8x256xf32> to vector<8x128xf32>
    %c0_13 = arith.constant 0 : index
    %c0_14 = arith.constant 0 : index
    %24 = vector.load %arg9[%c0_13, %c0_14] : memref<1x128xf32, #tpu.memory_space<vmem>>, vector<1x128xf32>
    %25 = vector.broadcast %24 : vector<1x128xf32> to vector<8x128xf32>
    %26 = arith.addf %23, %25 : vector<8x128xf32>
    %27 = arith.mulf %18, %26 : vector<8x128xf32>
    %28 = arith.addf %22, %27 : vector<8x128xf32>
    %29 = math.tanh %28 : vector<8x128xf32>
    %c0_15 = arith.constant 0 : index
    %c0_16 = arith.constant 0 : index
    %30 = vector.load %arg3[%c0_15, %c0_16] : memref<8x128xf32, #tpu.memory_space<vmem>>, vector<8x128xf32>
    %c0_17 = arith.constant 0 : index
    %c0_18 = arith.constant 0 : index
    %31 = vector.load %arg4[%c0_17, %c0_18] : memref<8x1xf32, #tpu.memory_space<vmem>>, vector<8x1xf32>
    %32 = arith.subf %29, %30 : vector<8x128xf32>
    %33 = vector.broadcast %31 : vector<8x1xf32> to vector<8x128xf32>
    %34 = arith.mulf %33, %32 : vector<8x128xf32>
    %35 = arith.addf %30, %34 : vector<8x128xf32>
    %c0_19 = arith.constant 0 : index
    %c0_20 = arith.constant 0 : index
    %36 = vector.load %arg10[%c0_19, %c0_20] : memref<8x128xf32, #tpu.memory_space<vmem>>, vector<8x128xf32>
    tpu.vector_store %arg10[%c0_19, %c0_20], %35 {strides = array<i32>} : memref<8x128xf32, #tpu.memory_space<vmem>>, vector<8x128xf32>,
    return
  }
  func.func @transform_0(%arg0: i32, %arg1: i32) -> (i32, i32) {
    %c0_i32 = arith.constant 0 : i32
    %c0_i32_0 = arith.constant 0 : i32
    return %arg1, %c0_i32 : i32, i32
  }
  func.func @transform_1(%arg0: i32, %arg1: i32) -> (i32, i32) {
    %c0_i32 = arith.constant 0 : i32
    %c0_i32_0 = arith.constant 0 : i32
    return %arg1, %c0_i32 : i32, i32
  }
  func.func @transform_2(%arg0: i32, %arg1: i32) -> (i32, i32) {
    %c0_i32 = arith.constant 0 : i32
    %c0_i32_0 = arith.constant 0 : i32
    return %arg1, %c0_i32 : i32, i32
  }
  func.func @transform_3(%arg0: i32, %arg1: i32) -> (i32, i32) {
    %c0_i32 = arith.constant 0 : i32
    %c0_i32_0 = arith.constant 0 : i32
    return %c0_i32, %arg0 : i32, i32
  }
  func.func @transform_4(%arg0: i32, %arg1: i32) -> (i32, i32) {
    %c0_i32 = arith.constant 0 : i32
    %c0_i32_0 = arith.constant 0 : i32
    return %c0_i32, %arg0 : i32, i32
  }
  func.func @transform_5(%arg0: i32, %arg1: i32) -> (i32, i32) {
    %c0_i32 = arith.constant 0 : i32
    %c0_i32_0 = arith.constant 0 : i32
    return %c0_i32, %arg0 : i32, i32
  }
  func.func @transform_6(%arg0: i32, %arg1: i32) -> (i32, i32) {
    %c0_i32 = arith.constant 0 : i32
    %c0_i32_0 = arith.constant 0 : i32
    return %c0_i32, %arg0 : i32, i32
  }
  func.func @transform_7(%arg0: i32, %arg1: i32) -> (i32, i32) {
    %c0_i32 = arith.constant 0 : i32
    %c0_i32_0 = arith.constant 0 : i32
    return %c0_i32, %arg0 : i32, i32
  }
  func.func @transform_8(%arg0: i32, %arg1: i32) -> (i32, i32) {
    %c0_i32 = arith.constant 0 : i32
    return %arg1, %arg0 : i32, i32
  }
}

</mosaic_0001>

<bundles_post_ra>
// kernel: tpu_custom_call.1
= control target key start
LH: loop header
LB: loop body
LE: loop exit
PB: predicated region body
PF: predicated region fallthrough
CT: control target
= control target key end

     0   :  { %13 = vsyncpa [#allocation3], 0  ;;  %s721_s0 = inlined_call_operand.vmem [shape: f32[8,128], index: 0, kind: input, shape index: {}]   ;;  %s722_s1 = inlined_call_operand.hbm [shape: f32[8,128], index: 1, kind: input, shape index: {}]   ;;  %s723_s2 = inlined_call_operand.vmem [shape: f32[8,1], index: 2, kind: input, shape index: {}]   ;;  %s724_s3 = inlined_call_operand.hbm [shape: bf16[128,256], index: 3, kind: input, shape index: {}]   ;;  %s725_s4 = inlined_call_operand.hbm [shape: bf16[128,256], index: 4, kind: input, shape index: {}]   ;;  %s726_s5 = inlined_call_operand.vmem [shape: f32[1,128], index: 5, kind: input, shape index: {}]   ;;  %s727_s6 = inlined_call_operand.vmem [shape: f32[1,128], index: 6, kind: input, shape index: {}]   ;;  %s728_s7 = inlined_call_operand.vmem [shape: f32[1,128], index: 7, kind: input, shape index: {}]   ;;  %s729_s8 = inlined_call_operand.hbm [shape: f32[8,128], index: 8, kind: output, shape index: {}]  }
   0x1   :  { %14 = vsyncpa [#allocation6], 0 }
   0x2   :  { %15 = vsyncpa [#allocation4], 0  ;;  %s600_s27 = smov [#allocation5]   ;;  %s506_s9 = scalar_lea.hbm %s724_s3, 2048 }
   0x3   :  { %s35_s28 = sshll.u32 %s600_s27, 4  ;;  %p507_p0 = scmp.ne.s32.totalorder %s724_s3, %s506_s9  ;;  %s36_s28 = int_to_ptr.vmem [resolvable:$true] %s35_s28 }
   0x4   :  { %p510_p1 = scmp.lt.u32.totalorder %s506_s9, %s724_s3 }
   0x6   :  { %p512_p2 = pnand %p510_p1, %p507_p0 }
   0x8   :  { %515 = shalt.err (!%p512_p2)
}
   0x9   :  { %s516_s14 = scalar_lea.vmem %s36_s28, 2048  ;;  %p521_p4 = scmp.lt.s32.totalorder %s36_s28, %s36_s28 }
   0xa   :  { %p517_p3 = scmp.ne.s32.totalorder %s36_s28, %s516_s14  ;;  %p522_p5 = scmp.lt.s32.totalorder %s516_s14, %s516_s14 }
   0xc   :  { %p523_p6 = por %p522_p5, %p521_p4 }
   0xe   :  { %p524_p7 = pnand %p523_p6, %p517_p3 }
  0x10   :  { %527 = shalt.err (!%p524_p7)
}
  0x11   :  { %s601_s15 = smov 128   ;;  %s602_s16 = smov 8  }
  0x12   :  { %41 = dma.hbm_to_vmem [thread:$0]  %s724_s3, 2048, %s36_s28, [#allocation6], %s601_s15, %s601_s15, %s602_s16  }
  0x13   :  { %s603_s19 = smov [#allocation2]   ;;  %s604_s21 = smov [#allocation7]  }
  0x14   :  { %s24_s20 = sshll.u32 %s603_s19, 4  ;;  %s47_s22 = sshll.u32 %s604_s21, 4  ;;  %s25_s20 = int_to_ptr.vmem [resolvable:$true] %s24_s20  ;;  %s48_s22 = int_to_ptr.vmem [resolvable:$true] %s47_s22 }
  0x15   :  { %s528_s25 = scalar_lea.hbm %s722_s1, 128 }
  0x16   :  { %p529_p8 = scmp.ne.s32.totalorder %s722_s1, %s528_s25  ;;  %p532_p9 = scmp.lt.u32.totalorder %s528_s25, %s722_s1 }
  0x18   :  { %p534_p10 = pnand %p532_p9, %p529_p8 }
  0x1a   :  { %537 = shalt.err (!%p534_p10)
}
  0x1b   :  { %s538_s3 = scalar_lea.vmem %s25_s20, 128  ;;  %p543_p12 = scmp.lt.s32.totalorder %s25_s20, %s25_s20 }
  0x1c   :  { %p539_p11 = scmp.ne.s32.totalorder %s25_s20, %s538_s3  ;;  %p544_p13 = scmp.lt.s32.totalorder %s538_s3, %s538_s3 }
  0x1e   :  { %p545_p0 = por %p544_p13, %p543_p12 }
  0x20   :  { %p546_p1 = pnand %p545_p0, %p539_p11 }
  0x22   :  { %549 = shalt.err (!%p546_p1)
}
  0x23   :  { %27 = dma.hbm_to_vmem [thread:$0]  %s722_s1, 128, %s25_s20, [#allocation3]  }
  0x24   :  { %s550_s12 = scalar_lea.hbm %s725_s4, 2048 }
  0x25   :  { %p551_p2 = scmp.ne.s32.totalorder %s725_s4, %s550_s12  ;;  %p554_p3 = scmp.lt.u32.totalorder %s550_s12, %s725_s4 }
  0x27   :  { %p556_p4 = pnand %p554_p3, %p551_p2 }
  0x29   :  { %559 = shalt.err (!%p556_p4)
}
  0x2a   :  { %s560_s19 = scalar_lea.vmem %s48_s22, 2048  ;;  %p565_p6 = scmp.lt.s32.totalorder %s48_s22, %s48_s22 }
  0x2b   :  { %p561_p5 = scmp.ne.s32.totalorder %s48_s22, %s560_s19  ;;  %p566_p7 = scmp.lt.s32.totalorder %s560_s19, %s560_s19 }
  0x2d   :  { %p567_p8 = por %p566_p7, %p565_p6 }
  0x2f   :  { %p568_p9 = pnand %p567_p8, %p561_p5 }
  0x31   :  { %571 = shalt.err (!%p568_p9)
}
  0x32   :  { %53 = dma.hbm_to_vmem [thread:$0]  %s725_s4, 2048, %s48_s22, [#allocation6], %s601_s15, %s601_s15, %s602_s16  }
  0x33   :  { %594 = dma.done.wait [#allocation3], 128  }
  0x34   :  { %595 = vsyncadd [#allocation3], 4294967168 }
  0x35   :  { %596 = dma.done.wait [#allocation6], 4096  }
  0x36   :  { %597 = vsyncadd [#allocation6], 4294963200  ;;  %v605_v0 = vmov 0   ;;  %v452_v1 = vld [vmem:[#allocation5 + $0x4] ss:$8 sps:$4 sm:$0xff]   ;;  %v382_v27 = vld [vmem:[%s723_s2] sm:$0xff] }
  0x37   :  { %202 = vmatprep.mubr.bf16.mxu0 %v605_v0  ;;  %339 = vmatprep.mubr.bf16.mxu1 %v605_v0  ;;  %v454_v2 = vld [vmem:[#allocation7 + $0x4] ss:$8 sps:$4 sm:$0xff]   ;;  %v456_v3 = vld [vmem:[#allocation5] ss:$8 sps:$4 sm:$0xff]   ;;  %v458_v5 = vld [vmem:[#allocation5 + $0x14] ss:$8 sps:$4 sm:$0xff]  }
  0x38   :  { %451 = vset.pattern.permute.xlu0 %v605_v0  ;;  %170 = vmatprep.subr.bf16.mxu0 %v452_v1  ;;  %v457_v4 = vld [vmem:[#allocation7] ss:$8 sps:$4 sm:$0xff]   ;;  %v460_v6 = vld [vmem:[#allocation7 + $0x14] ss:$8 sps:$4 sm:$0xff]   ;;  %v462_v7 = vld [vmem:[#allocation5 + $0x10] ss:$8 sps:$4 sm:$0xff]  }
  0x39   :  { %307 = vmatprep.subr.bf16.mxu1 %v454_v2  ;;  %171 = vmatpush1.bf16.msra.mxu0 %v456_v3  ;;  %v463_v8 = vld [vmem:[#allocation7 + $0x10] ss:$8 sps:$4 sm:$0xff]   ;;  %v464_v9 = vld [vmem:[#allocation5 + $0x24] ss:$8 sps:$4 sm:$0xff]   ;;  %v468_v11 = vld [vmem:[#allocation5 + $0x20] ss:$8 sps:$4 sm:$0xff]  }
  0x3a   :  { %308 = vmatpush1.bf16.msra.mxu1 %v457_v4  ;;  %172 = vmatprep.subr.bf16.mxu0 %v458_v5  ;;  %v466_v10 = vld [vmem:[#allocation7 + $0x24] ss:$8 sps:$4 sm:$0xff]   ;;  %v469_v12 = vld [vmem:[#allocation7 + $0x20] ss:$8 sps:$4 sm:$0xff]   ;;  %v470_v13 = vld [vmem:[#allocation5 + $0x34] ss:$8 sps:$4 sm:$0xff]  }
  0x3b   :  { %309 = vmatprep.subr.bf16.mxu1 %v460_v6  ;;  %v472_v14 = vld [vmem:[#allocation7 + $0x34] ss:$8 sps:$4 sm:$0xff]   ;;  %v474_v15 = vld [vmem:[#allocation5 + $0x30] ss:$8 sps:$4 sm:$0xff]   ;;  %v476_v17 = vld [vmem:[#allocation5 + $0x44] ss:$8 sps:$4 sm:$0xff]   ;;  %386 = vperm.xlu0 %451, %v382_v27  }
  0x3c   :  { %v475_v16 = vld [vmem:[#allocation7 + $0x30] ss:$8 sps:$4 sm:$0xff]   ;;  %v478_v18 = vld [vmem:[#allocation7 + $0x44] ss:$8 sps:$4 sm:$0xff]   ;;  %v480_v19 = vld [vmem:[#allocation5 + $0x40] ss:$8 sps:$4 sm:$0xff]  }
  0x3d   :  { %173 = vmatpush1.bf16.msra.mxu0 %v462_v7  ;;  %v481_v20 = vld [vmem:[#allocation7 + $0x40] ss:$8 sps:$4 sm:$0xff]   ;;  %v482_v21 = vld [vmem:[#allocation5 + $0x54] ss:$8 sps:$4 sm:$0xff]   ;;  %v486_v23 = vld [vmem:[#allocation5 + $0x50] ss:$8 sps:$4 sm:$0xff]  }
  0x3e   :  { %310 = vmatpush1.bf16.msra.mxu1 %v463_v8  ;;  %174 = vmatprep.subr.bf16.mxu0 %v464_v9  ;;  %v484_v22 = vld [vmem:[#allocation7 + $0x54] ss:$8 sps:$4 sm:$0xff]   ;;  %v487_v24 = vld [vmem:[#allocation7 + $0x50] ss:$8 sps:$4 sm:$0xff]   ;;  %v488_v25 = vld [vmem:[#allocation5 + $0x64] ss:$8 sps:$4 sm:$0xff]  }
  0x3f   :  { %311 = vmatprep.subr.bf16.mxu1 %v466_v10  ;;  %v490_v26 = vld [vmem:[#allocation7 + $0x64] ss:$8 sps:$4 sm:$0xff]   ;;  %v492_v28 = vld [vmem:[#allocation5 + $0x60] ss:$8 sps:$4 sm:$0xff]   ;;  %v494_v30 = vld [vmem:[#allocation5 + $0x74] ss:$8 sps:$4 sm:$0xff]  }
  0x40   :  { %v493_v29 = vld [vmem:[#allocation7 + $0x60] ss:$8 sps:$4 sm:$0xff]   ;;  %v496_v31 = vld [vmem:[#allocation7 + $0x74] ss:$8 sps:$4 sm:$0xff]   ;;  %v498_v32 = vld [vmem:[#allocation5 + $0x70] ss:$8 sps:$4 sm:$0xff]  }
  0x41   :  { %175 = vmatpush1.bf16.msra.mxu0 %v468_v11  ;;  %v499_v33 = vld [vmem:[#allocation7 + $0x70] ss:$8 sps:$4 sm:$0xff]  }
  0x42   :  { %312 = vmatpush1.bf16.msra.mxu1 %v469_v12  ;;  %176 = vmatprep.subr.bf16.mxu0 %v470_v13  ;;  %v70_v34 = vld [vmem:[%s721_s0] sm:$0xff] }
  0x43   :  { %313 = vmatprep.subr.bf16.mxu1 %v472_v14  ;;  %v72_v35 = vld [vmem:[#allocation2] sm:$0xff]  ;;  %v71_v36 = vpack.c.bf16 %v70_v34, %v70_v34 }
  0x44   :  { %v73_v37 = vpack.c.bf16 %v72_v35, %v72_v35  ;;  %v440_v40 = vld [vmem:[%s726_s5] ss:$0 sm:$0xff]  ;;  %s606_s5 = smov [#allocation8]  }
  0x45   :  { %177 = vmatpush1.bf16.msra.mxu0 %v474_v15  ;;  %v443_v52 = vld [vmem:[%s728_s7] ss:$0 sm:$0xff]  ;;  %s398_s26 = sshll.u32 %s606_s5, 4  ;;  %s399_s26 = int_to_ptr.vmem [resolvable:$true] %s398_s26 }
  0x46   :  { %314 = vmatpush1.bf16.msra.mxu1 %v475_v16  ;;  %178 = vmatprep.subr.bf16.mxu0 %v476_v17  ;;  %v442_v53 = vld [vmem:[%s727_s6] ss:$0 sm:$0xff]  ;;  %s572_s7 = scalar_lea.vmem %s399_s26, 128  ;;  %p577_p11 = scmp.lt.s32.totalorder %s399_s26, %s399_s26 }
  0x47   :  { %315 = vmatprep.subr.bf16.mxu1 %v478_v18  ;;  %p573_p10 = scmp.ne.s32.totalorder %s399_s26, %s572_s7  ;;  %p578_p12 = scmp.lt.s32.totalorder %s572_s7, %s572_s7 }
  0x49   :  { %179 = vmatpush1.bf16.msra.mxu0 %v480_v19  ;;  %p579_p13 = por %p578_p12, %p577_p11 }
  0x4a   :  { %316 = vmatpush1.bf16.msra.mxu1 %v481_v20  ;;  %180 = vmatprep.subr.bf16.mxu0 %v482_v21 }
  0x4b   :  { %317 = vmatprep.subr.bf16.mxu1 %v484_v22  ;;  %p580_p0 = pnand %p579_p13, %p573_p10 }
  0x4d   :  { %181 = vmatpush1.bf16.msra.mxu0 %v486_v23 }
  0x4e   :  { %318 = vmatpush1.bf16.msra.mxu1 %v487_v24  ;;  %182 = vmatprep.subr.bf16.mxu0 %v488_v25 }
  0x4f   :  { %319 = vmatprep.subr.bf16.mxu1 %v490_v26 }
  0x51   :  { %183 = vmatpush1.bf16.msra.mxu0 %v492_v28 }
  0x52   :  { %320 = vmatpush1.bf16.msra.mxu1 %v493_v29  ;;  %184 = vmatprep.subr.bf16.mxu0 %v494_v30 }
  0x53   :  { %321 = vmatprep.subr.bf16.mxu1 %v496_v31 }
  0x55   :  { %185 = vmatpush1.bf16.msra.mxu0 %v498_v32 }
  0x56   :  { %322 = vmatpush1.bf16.msra.mxu1 %v499_v33 }
  0x58   :  { %203 = vmatmul.mubr.bf16.vlgmr.msra.gmra.mrb[0].mxu0 %v71_v36 }
  0x59   :  { %340 = vmatmul.mubr.bf16.vlgmr.msra.gmra.mrb[0].mxu1 %v73_v37 }
  0xba   :  { %v387_v60 = vpop.permute.xlu0 %386 }
 0x12b   :  { %v204_v38 = vpop.f32.mrb[0].mxu0 }
 0x12c   :  { %v341_v39 = vpop.f32.mrb[0].mxu1  ;;  %v206_v42 = vpop.f32.mrb[1].mxu0 }
 0x12d   :  { %v348_v41 = vadd.f32 %v341_v39, %v204_v38  ;;  %v343_v43 = vpop.f32.mrb[1].mxu1  ;;  %v208_v44 = vpop.f32.mrb[2].mxu0  ;;  %v370_v56 = vadd.f32 %v442_v53, %v206_v42 }
 0x12e   :  { %v345_v45 = vpop.f32.mrb[2].mxu1  ;;  %v209_v47 = vpop.f32.mrb[3].mxu0  ;;  %v378_v54 = vadd.f32 %v443_v52, %v343_v43 }
 0x12f   :  { %v356_v46 = vadd.f32 %v440_v40, %v348_v41  ;;  %v346_v48 = vpop.f32.mrb[3].mxu1 }
 0x131   :  { %v441_v49 = vmul.f32 -1.442695, %v356_v46 }
 0x133   :  { %500 = vpow2.f32 %v441_v49 }
 0x13d   :  { %v501_v50 = vpop.eup %500 }
 0x13e   :  { %v360_v51 = vadd.f32 1.0, %v501_v50 }
 0x140   :  { %502 = vrcp.f32 %v360_v51 }
 0x14a   :  { %v503_v55 = vpop.eup %502 }
 0x14b   :  { %v379_v57 = vmul.f32 %v503_v55, %v378_v54 }
 0x14d   :  { %v380_v58 = vadd.f32 %v379_v57, %v370_v56 }
 0x14f   :  { %504 = vtanh.f32 %v380_v58 }
 0x159   :  { %v505_v59 = vpop.eup %504 }
 0x15a   :  { %v383_v61 = vsub.f32 %v505_v59, %v72_v35 }
 0x15c   :  { %v389_v62 = vmul.f32 %v387_v60, %v383_v61 }
 0x15e   :  { %v390_v63 = vadd.f32 %v389_v62, %v72_v35 }
 0x160   :  { %391 = vst [vmem:[#allocation8] sm:$0xff] %v390_v63 }
 0x161   :  { %583 = shalt.err (!%p580_p0)
}
 0x162   :  { %s584_s29 = scalar_lea.hbm %s729_s8, 128 }
 0x163   :  { %p585_p1 = scmp.ne.s32.totalorder %s729_s8, %s584_s29  ;;  %p588_p2 = scmp.lt.u32.totalorder %s584_s29, %s729_s8 }
 0x165   :  { %p590_p3 = pnand %p588_p2, %p585_p1 }
 0x167   :  { %593 = shalt.err (!%p590_p3)
}
 0x168   :  { %401 = dma.vmem_to_hbm [thread:$0]  %s399_s26, 128, %s729_s8, [#allocation4]  }
 0x169   :  { %598 = dma.done.wait [#allocation4], 128  }
 0x16a   :  { %599 = vsyncadd [#allocation4], 4294967168 }
 0x16b   :  { %405 = vsyncpa [#allocation3], 1 }
 0x16c   :  { %406 = vsyncpa [#allocation6], 1 }
 0x16d   :  { %407 = vsyncpa [#allocation4], 1 }

</bundles_post_ra>
